<compile_context>
chip_gen: v5e
topology: v5e:2x2
jax: 0.10.0
libtpu: 0.0.40
codegen_flags: <defaults>
</compile_context>

<pallas_src>
import functools

import numpy as np
import jax
import jax.numpy as jnp
from jax.experimental import pallas as pl
from jax.experimental.pallas import tpu as pltpu

BN_EPS = 1e-5
C_PAD = 16            # channel padding (max channel count in the network)
K_MAX = 9 * C_PAD     # stacked contraction rows for a 3x3 conv (144)


# ---------------------------------------------------------------------------
# pltpu.roll rotation-direction probe (run once, outside jit).  The fused
# kernel needs "shifted[p] = x[p + off]"; this pins down the sign robustly.
# ---------------------------------------------------------------------------
_ROLL_SIGN = None


def _probe_roll_sign():
    def k(x_ref, o_ref):
        o_ref[...] = pltpu.roll(x_ref[...], 5, 1)

    x = np.arange(8 * 256, dtype=np.float32).reshape(8, 256)
    y = pl.pallas_call(
        k, out_shape=jax.ShapeDtypeStruct((8, 256), jnp.float32))(jnp.asarray(x))
    y = np.asarray(jax.block_until_ready(y))
    if np.array_equal(y, np.roll(x, 5, axis=1)):
        return -1          # numpy convention: roll(x, -off)[p] == x[p + off]
    if np.array_equal(y, np.roll(x, -5, axis=1)):
        return 1
    raise RuntimeError("unexpected pltpu.roll semantics")


def _ensure_roll_sign():
    global _ROLL_SIGN
    if _ROLL_SIGN is None:
        _ROLL_SIGN = _probe_roll_sign()
    return _ROLL_SIGN


# ---------------------------------------------------------------------------
# Fused Net2 forward kernel.  One grid step processes the whole image slab:
# activations are (16, L) with channels on sublanes and the lane axis holding
# all images back-to-back (per-image stride `seg`).  Every conv tap is a lane
# roll (XLU) written into a (144, L) VMEM scratch, then one MXU matmul.
# ---------------------------------------------------------------------------
def _net2_fused_kernel(x_ref, w_ref, mask_ref, o_ref, stk_ref,
                       *, img_w, seg, n_img, roll_sign):
    L = x_ref.shape[-1]                        # n_img * seg lanes
    f32 = jnp.float32

    def shift(a, off):
        # shifted[:, p] == a[:, p + off] for every position that is ever valid.
        if off == 0:
            return a
        return pltpu.roll(a, (roll_sign * off) % L, 1)

    def wblk(l, k):                            # packed weights of layer l
        return w_ref[pl.ds(16 * l, 16), pl.ds(0, k)]

    def cblk(l):                               # folded-BN bias added after layer l
        return w_ref[pl.ds(112, 16), pl.ds(l, 1)]            # (16, 1)

    def stack_taps(a, sy, sx):                 # a: (16, L) -> scratch rows [0,144)
        for dy in range(3):
            for dx in range(3):
                stk_ref[pl.ds((dy * 3 + dx) * C_PAD, C_PAD), :] = (
                    shift(a, dy * sy + dx * sx))

    # --- conv1 (cin=1): 9 taps into rows 0..8, rows 8..15 pre-zeroed ---------
    x = x_ref[0]                               # (1, L)
    stk_ref[pl.ds(8, 8), :] = jnp.zeros((8, L), f32)
    for dy in range(3):
        for dx in range(3):
            stk_ref[pl.ds(dy * 3 + dx, 1), :] = shift(x, dy * img_w + dx)
    r = jnp.maximum(
        jnp.dot(wblk(0, 16), stk_ref[pl.ds(0, 16), :],
                preferred_element_type=f32), 0.0)             # (16, L)

    # --- conv2 (+ folded BN1) ------------------------------------------------
    stack_taps(r, img_w, 1)
    r = jnp.maximum(
        jnp.dot(wblk(1, K_MAX), stk_ref[...], preferred_element_type=f32)
        + cblk(1), 0.0)

    # --- conv3 1x1 (+ folded BN2) --------------------------------------------
    a = jnp.dot(wblk(2, 16), r, preferred_element_type=f32) + cblk(2)

    # --- MaxPool2d(2,2): result lives on the stride-2 sub-grid of same lanes --
    a = jnp.maximum(jnp.maximum(a, shift(a, 1)),
                    jnp.maximum(shift(a, img_w), shift(a, img_w + 1)))

    # --- conv4 (no preceding BN) ----------------------------------------------
    stack_taps(a, 2 * img_w, 2)
    r = jnp.maximum(
        jnp.dot(wblk(3, K_MAX), stk_ref[...], preferred_element_type=f32), 0.0)

    # --- conv5 (+ folded BN4) -------------------------------------------------
    stack_taps(r, 2 * img_w, 2)
    r = jnp.maximum(
        jnp.dot(wblk(4, K_MAX), stk_ref[...], preferred_element_type=f32)
        + cblk(4), 0.0)

    # --- conv6 (+ folded BN5) -------------------------------------------------
    stack_taps(r, 2 * img_w, 2)
    r = jnp.maximum(
        jnp.dot(wblk(5, K_MAX), stk_ref[...], preferred_element_type=f32)
        + cblk(5), 0.0)

    # TODO(synk): Dropout (p=0.1) is identity in eval mode; training dropout
    #             is not implemented.

    # --- per-image masked GAP, 1x1 head (+ folded BN6), log_softmax -----------
    mask = mask_ref[...]                                       # (1, seg)
    cols = [jnp.sum(r[:, b * seg:(b + 1) * seg] * mask,
                    axis=1, keepdims=True) for b in range(n_img)]
    g = jnp.concatenate(cols, axis=1)                          # (16, n_img)
    logits = (jnp.dot(wblk(6, 16), g, preferred_element_type=f32)
              + cblk(6))[0:10, :]                              # (10, n_img)
    z = logits - jnp.max(logits, axis=0, keepdims=True)
    o_ref[0] = z - jnp.log(jnp.sum(jnp.exp(z), axis=0, keepdims=True))


# ---------------------------------------------------------------------------
# Wrapper: BN folding, weight packing, input/mask layout, pallas_call.
# ---------------------------------------------------------------------------
def _pack_conv(w, s_prev=None, cin_pad=C_PAD):
    # HWIO (kh,kw,cin,cout) -> (16, kh*kw*cin_pad); column t*cin_pad+ci holds
    # w[dy,dx,ci,co] * s_prev[ci]  (s_prev = folded scale of the PREVIOUS BN).
    kh, kw, cin, cout = w.shape
    if s_prev is not None:
        w = w * s_prev.reshape(1, 1, cin, 1)
    w = jnp.transpose(w, (3, 0, 1, 2))
    w = jnp.pad(w, ((0, C_PAD - cout), (0, 0), (0, 0), (0, cin_pad - cin)))
    return w.reshape(C_PAD, kh * kw * cin_pad)


def _fold_bias(w, b_prev):
    # Per-output-channel constant: this conv applied to the previous BN bias.
    c = jnp.einsum('hwic,i->c', w, b_prev)
    return jnp.pad(c, (0, C_PAD - c.shape[0]))


@functools.partial(jax.jit, static_argnames=("roll_sign",))
def _net2_forward_jit(x_nchw, params, roll_sign):
    B, cin, H, W = x_nchw.shape
    assert cin == 1
    n = H * W
    seg = ((n + 127) // 128) * 128             # per-image lane stride
    hf = (H - 4) // 2 - 6                      # final valid feature-map height
    wf = (W - 4) // 2 - 6
    # Geometry guard: final feature map non-empty, and every tap read of a
    # valid output stays within the image's own [0, H*W) lane span (true for
    # VALID convs whenever hf, wf >= 1), so lane rolls never alias images.
    assert hf >= 1 and wf >= 1 and seg >= n
    L = B * seg

    # Input slab: (1, 1, B*seg); image b occupies lanes [b*seg, b*seg + H*W).
    xs = x_nchw.reshape(B, 1, n).astype(jnp.float32)
    xs = jnp.pad(xs, ((0, 0), (0, 0), (0, seg - n)))
    xs = jnp.transpose(xs, (1, 0, 2)).reshape(1, 1, L)

    s1, b1 = (v.reshape(-1) for v in params['bn1'])
    s2, b2 = (v.reshape(-1) for v in params['bn2'])
    s4, b4 = (v.reshape(-1) for v in params['bn4'])
    s5, b5 = (v.reshape(-1) for v in params['bn5'])
    s6, b6 = (v.reshape(-1) for v in params['bn6'])

    # Single packed parameter buffer: rows 16*l..16*l+16 = layer-l weights,
    # rows 112..127 = folded-bias block (column l = bias added after layer l).
    wbuf = jnp.zeros((128, K_MAX), jnp.float32)
    wbuf = wbuf.at[0:16, 0:9].set(_pack_conv(params['w1'], cin_pad=1))
    wbuf = wbuf.at[16:32, :].set(_pack_conv(params['w2'], s1))
    wbuf = wbuf.at[32:48, 0:16].set(_pack_conv(params['w3'], s2))
    wbuf = wbuf.at[48:64, :].set(_pack_conv(params['w4']))
    wbuf = wbuf.at[64:80, :].set(_pack_conv(params['w5'], s4))
    wbuf = wbuf.at[80:96, :].set(_pack_conv(params['w6'], s5))
    w7p = jnp.pad((params['w7'] * s6.reshape(-1, 1)).T, ((0, 6), (0, 0)))
    wbuf = wbuf.at[96:112, 0:16].set(w7p)
    wbuf = wbuf.at[112:128, 1].set(_fold_bias(params['w2'], b1))
    wbuf = wbuf.at[112:128, 2].set(_fold_bias(params['w3'], b2))
    wbuf = wbuf.at[112:128, 4].set(_fold_bias(params['w5'], b4))
    wbuf = wbuf.at[112:128, 5].set(_fold_bias(params['w6'], b5))
    wbuf = wbuf.at[112:128, 6].set(jnp.pad(b6 @ params['w7'], (0, 6)))

    # Per-image GAP mask: 1/(hf*wf) at the valid stride-2 positions.
    mask_np = np.zeros((1, seg), np.float32)
    for yy in range(hf):
        for xx in range(wf):
            mask_np[0, 2 * yy * W + 2 * xx] = 1.0 / (hf * wf)
    mask = jnp.asarray(mask_np)

    kernel = functools.partial(_net2_fused_kernel, img_w=W, seg=seg,
                               n_img=B, roll_sign=roll_sign)
    out = pl.pallas_call(
        kernel,
        out_shape=jax.ShapeDtypeStruct((1, 10, B), jnp.float32),
        grid=(1,),
        in_specs=[pl.BlockSpec((1, 1, L), lambda i: (i, 0, 0)),
                  pl.BlockSpec((128, K_MAX), lambda i: (0, 0)),
                  pl.BlockSpec((1, seg), lambda i: (0, 0))],
        out_specs=pl.BlockSpec((1, 10, B), lambda i: (i, 0, 0)),
        scratch_shapes=[pltpu.VMEM((K_MAX, L), jnp.float32)],
        compiler_params=pltpu.CompilerParams(
            dimension_semantics=("arbitrary",)),
    )(xs, wbuf, mask)
    return out[0].T                            # (B, 10)


def net2_forward(x_nchw, params):
    return _net2_forward_jit(x_nchw, params, roll_sign=_ensure_roll_sign())


# ---------------------------------------------------------------------------
# Deterministic parameter construction (shapes dictated by Net2.__init__).
# ---------------------------------------------------------------------------
def _conv_w(k, kh, kw, cin, cout):
    fan_in = kh * kw * cin
    return (jax.random.normal(k, (kh, kw, cin, cout), jnp.float32)
            / jnp.sqrt(jnp.float32(fan_in)))


def _bn_fold(k, c):
    kg, kb, km, kv = jax.random.split(k, 4)
    gamma = 1.0 + 0.1 * jax.random.normal(kg, (c,), jnp.float32)
    beta = 0.1 * jax.random.normal(kb, (c,), jnp.float32)
    mean = 0.1 * jax.random.normal(km, (c,), jnp.float32)
    var = jnp.abs(jax.random.normal(kv, (c,), jnp.float32)) + 0.5
    scale = gamma / jnp.sqrt(var + BN_EPS)
    bias = beta - mean * scale
    return scale.reshape(1, c), bias.reshape(1, c)


def init_params(key):
    ks = jax.random.split(key, 12)
    p = {}
    p['w1'], p['bn1'] = _conv_w(ks[0], 3, 3, 1, 16), _bn_fold(ks[1], 16)
    p['w2'], p['bn2'] = _conv_w(ks[2], 3, 3, 16, 16), _bn_fold(ks[3], 16)
    p['w3'] = _conv_w(ks[4], 1, 1, 16, 10)
    p['w4'], p['bn4'] = _conv_w(ks[5], 3, 3, 10, 10), _bn_fold(ks[6], 10)
    p['w5'], p['bn5'] = _conv_w(ks[7], 3, 3, 10, 16), _bn_fold(ks[8], 16)
    p['w6'], p['bn6'] = _conv_w(ks[9], 3, 3, 16, 16), _bn_fold(ks[10], 16)
    p['w7'] = _conv_w(ks[11], 1, 1, 16, 10)[0, 0]            # (16, 10)
    return p


# ---------------------------------------------------------------------------
# Plain-JAX reference for validation (eval-mode Net2).
# ---------------------------------------------------------------------------
def net2_reference(x_nchw, params):
    x = jnp.transpose(x_nchw, (0, 2, 3, 1)).astype(jnp.float32)   # NCHW -> NHWC
    conv = lambda x, w: jax.lax.conv_general_dilated(
        x, w, (1, 1), 'VALID', dimension_numbers=('NHWC', 'HWIO', 'NHWC'))

    def block(x, w, sb):
        scale, bias = sb
        y = jnp.maximum(conv(x, w), 0.0)
        return y * scale.reshape(1, 1, 1, -1) + bias.reshape(1, 1, 1, -1)

    x = block(x, params['w1'], params['bn1'])
    x = block(x, params['w2'], params['bn2'])
    x = conv(x, params['w3'])
    x = jax.lax.reduce_window(x, -jnp.inf, jax.lax.max,
                              (1, 2, 2, 1), (1, 2, 2, 1), 'VALID')
    x = block(x, params['w4'], params['bn4'])
    x = block(x, params['w5'], params['bn5'])
    x = block(x, params['w6'], params['bn6'])
    g = jnp.mean(x, axis=(1, 2))                                   # (B, 16)
    logits = g @ params['w7']                                      # (B, 10)
    return jax.nn.log_softmax(logits, axis=-1)


if __name__ == "__main__":
    key = jax.random.PRNGKey(0)
    pkey, xkey = jax.random.split(key)
    params = init_params(pkey)

    # PyTorch-style NCHW input: batch=2, channels=1, 28x28 (MNIST-sized, as the
    # architecture implies: 28 -> 26 -> 24 -> pool 12 -> 10 -> 8 -> 6 -> GAP).
    x = jax.random.normal(xkey, (2, 1, 28, 28), jnp.float32)

    out = jax.block_until_ready(net2_forward(x, params))
    assert out.shape == (2, 10), out.shape

    ref = jax.block_until_ready(net2_reference(x, params))
    err = float(jnp.max(jnp.abs(out - ref)))
    assert err < 1e-3, err

    print("KERNEL_OK")
</pallas_src>

<mosaic_0001>
module attributes {stable_mosaic.version = 11 : i64} {
  func.func @k(%arg0: memref<8x256xf32, #tpu.memory_space<vmem>>, %arg1: memref<8x256xf32, #tpu.memory_space<vmem>>) attributes {dimension_semantics = [], scalar_prefetch = 0 : i64, scratch_operands = 0 : i64, tpu.core_type = #tpu.core_type<tc>} {
    %c0 = arith.constant 0 : index
    %c0_0 = arith.constant 0 : index
    %0 = vector.load %arg0[%c0, %c0_0] : memref<8x256xf32, #tpu.memory_space<vmem>>, vector<8x256xf32>
    %c5_i32 = arith.constant 5 : i32
    %1 = tpu.dynamic_rotate %0 by %c5_i32 dim 1 : vector<8x256xf32>, i32 -> vector<8x256xf32>
    %c0_1 = arith.constant 0 : index
    %c0_2 = arith.constant 0 : index
    %2 = vector.load %arg1[%c0_1, %c0_2] : memref<8x256xf32, #tpu.memory_space<vmem>>, vector<8x256xf32>
    tpu.vector_store %arg1[%c0_1, %c0_2], %1 {strides = array<i32>} : memref<8x256xf32, #tpu.memory_space<vmem>>, vector<8x256xf32>,
    return
  }
}

</mosaic_0001>

<bundles_post_ra>
// kernel: tpu_custom_call.1
= control target key start
LH: loop header
LB: loop body
LE: loop exit
PB: predicated region body
PF: predicated region fallthrough
CT: control target
= control target key end

     0   :  { %6 = vsyncpa [#allocation3], 0  ;;  %s127_s0 = inlined_call_operand.hbm [shape: f32[8,256], index: 0, kind: input, shape index: {}]   ;;  %s128_s1 = inlined_call_operand.hbm [shape: f32[8,256], index: 1, kind: output, shape index: {}]  }
   0x1   :  { %7 = vsyncpa [#allocation4], 0  ;;  %s13_s8 = sshll.u32 %s127_s0, 4  ;;  %s108_s9 = smov [#allocation2]   ;;  %s14_s8 = int_to_ptr.hbm [resolvable:$true] %s13_s8 }
   0x2   :  { %s15_s10 = sshll.u32 %s108_s9, 4  ;;  %s16_s10 = int_to_ptr.vmem [resolvable:$true] %s15_s10 }
   0x3   :  { %18 = dma.hbm_to_vmem [thread:$0]  %s14_s8, 256, %s16_s10, [#allocation3]  }
   0x4   :  { %104 = dma.done.wait [#allocation3], 256  }
   0x5   :  { %105 = vsyncadd [#allocation3], 4294967040  ;;  %v23_v0 = vld [vmem:[#allocation2] sm:$0xff]  ;;  %s109_s11 = smov 5   ;;  %v24_v1 = vld [vmem:[#allocation2 + $0x8] sm:$0xff]  ;;  %v29_v2 = vlaneseq  ;;  %s110_s12 = smov [#allocation5]  }
   0x6   :  { %25 = vrot.lane.b32.xlu0 %v23_v0, %s109_s11  ;;  %s41_s13 = sshll.u32 %s110_s12, 4  ;;  %s43_s15 = sshll.u32 %s128_s1, 4  ;;  %s42_s13 = int_to_ptr.vmem [resolvable:$true] %s41_s13  ;;  %s44_s15 = int_to_ptr.hbm [resolvable:$true] %s43_s15 }
   0x7   :  { %v30_v4 = vand.u32 127, %v29_v2 }
   0x9   :  { %vm31_vm0 = vcmp.lt.s32.totalorder %v30_v4, 5 }
   0xe   :  { %27 = vrot.lane.b32.xlu0 %v24_v1, %s109_s11 }
  0x78   :  { %v26_v3 = vpop.permute.xlu0 %25 }
  0x80   :  { %v28_v5 = vpop.permute.xlu0 %27 }
  0x81   :  { %v32_v6 = vsel %vm31_vm0, %v26_v3, %v28_v5  ;;  %v33_v7 = vsel %vm31_vm0, %v28_v5, %v26_v3 }
  0x82   :  { %34 = vst [vmem:[#allocation5] sm:$0xff] %v33_v7 }
  0x83   :  { %35 = vst [vmem:[#allocation5 + $0x8] sm:$0xff] %v32_v6 }
  0x84   :  { %46 = dma.vmem_to_hbm [thread:$0]  %s42_s13, 256, %s44_s15, [#allocation4]  }
  0x85   :  { %106 = dma.done.wait [#allocation4], 256  }
  0x86   :  { %107 = vsyncadd [#allocation4], 4294967040 }
  0x87   :  { %51 = vsyncpa [#allocation3], 1 }
  0x88   :  { %52 = vsyncpa [#allocation4], 1 }

</bundles_post_ra>
